<compile_context>
chip_gen: v7x
topology: tpu7x:2x2x1
jax: 0.10.0
libtpu: 0.0.40
codegen_flags: <defaults>
</compile_context>

<pallas_src>
import jax
import jax.numpy as jnp
from jax.experimental import pallas as pl
from jax.experimental.pallas import tpu as pltpu


# ----------------------------- Pallas kernel ------------------------------- #

def _enc_dec_kernel(x_ref, we_ref, be_ref, wd_ref, bd_ref, o_ref):
    # encoder: (TM,192) @ (192,16) + b_enc   -- stays in VMEM/vregs
    feat = (jnp.dot(x_ref[...], we_ref[...], preferred_element_type=jnp.float32)
            + be_ref[...])
    # decoder: (TM,16) @ (16,192) + b_dec    -- lane-dense 192-wide output
    o_ref[...] = (jnp.dot(feat, wd_ref[...], preferred_element_type=jnp.float32)
                  + bd_ref[...])


def fused_encode_decode(patches, w_enc, b_enc, w_dec, b_dec):
    """patches:(M,192) -> (patches@w_enc+b_enc)@w_dec+b_dec, one pallas_call."""
    M, K = patches.shape
    C_mid = w_enc.shape[1]       # 16
    C_out = w_dec.shape[1]       # 192

    if M <= 1024:
        tm = M                   # whole row axis as a single block: no pad/slice
        m_pad = M
        x = patches
    else:
        tm = 512                 # big tiles (>=85% of HBM roofline), >=2 grid
        m_pad = pl.cdiv(M, tm) * tm      # steps so both v7x TCs get work
        x = jnp.pad(patches, ((0, m_pad - M), (0, 0)))

    out = pl.pallas_call(
        _enc_dec_kernel,
        out_shape=jax.ShapeDtypeStruct((m_pad, C_out), jnp.float32),
        grid=(m_pad // tm,),
        in_specs=[
            pl.BlockSpec((tm, K), lambda i: (i, 0)),
            pl.BlockSpec((K, C_mid), lambda i: (0, 0)),    # weights resident
            pl.BlockSpec((1, C_mid), lambda i: (0, 0)),
            pl.BlockSpec((C_mid, C_out), lambda i: (0, 0)),
            pl.BlockSpec((1, C_out), lambda i: (0, 0)),
        ],
        out_specs=pl.BlockSpec((tm, C_out), lambda i: (i, 0)),
        compiler_params=pltpu.CompilerParams(
            dimension_semantics=("parallel",)),
    )(x, w_enc, b_enc.reshape(1, C_mid), w_dec, b_dec.reshape(1, C_out))

    return out[:M] if m_pad != M else out


# ------------------------------- JAX glue ---------------------------------- #

def init_params(key):
    ks = jax.random.split(key, 4)

    def w(k, shape, scale=0.1):
        return (scale * jax.random.normal(k, shape)).astype(jnp.float32)

    return {
        "w_enc": w(ks[0], (16, 3, 8, 8)),      # Conv2d(3, 16, kernel_size=8, stride=8)
        "b_enc": w(ks[1], (16,)),
        "w_dec": w(ks[2], (192, 16, 1, 1)),    # Conv2d(16, 8*8*3, kernel_size=1)
        "b_dec": w(ks[3], (192,)),
    }


@jax.jit
def naive_ae_forward(x, params):
    N, C, H, W = x.shape                     # NCHW, C == 3, H % 8 == 0, W % 8 == 0
    hf, wf = H // 8, W // 8

    # encoder im2col: non-overlapping 8x8 patches.
    # rows ordered (n, hf, wf); cols ordered (ic, kh, kw) -> matches OIHW reshape.
    patches = (x.reshape(N, 3, hf, 8, wf, 8)
               .transpose(0, 2, 4, 1, 3, 5)
               .reshape(N * hf * wf, 3 * 64))

    w_enc = params["w_enc"].reshape(16, 192).T      # (192, 16)
    w_dec = params["w_dec"].reshape(192, 16).T      # (16, 192)

    dec = fused_encode_decode(patches, w_enc, params["b_enc"],
                              w_dec, params["b_dec"])   # (N*hf*wf, 192)

    # PixelShuffle(8): out[n, c, h*8+i, w*8+j] = dec[(n,h,w), c*64 + i*8 + j]
    rec = (dec.reshape(N, hf, wf, 3, 8, 8)
           .transpose(0, 3, 1, 4, 2, 5)
           .reshape(N, 3, H, W))
    return rec


def _reference(x, params):
    """Pure-JAX reference (lax convs + pixel shuffle) for a correctness check."""
    feat = jax.lax.conv_general_dilated(
        x, params["w_enc"], window_strides=(8, 8), padding="VALID",
        dimension_numbers=("NCHW", "OIHW", "NCHW"))
    feat = feat + params["b_enc"].reshape(1, 16, 1, 1)
    dec = jax.lax.conv_general_dilated(
        feat, params["w_dec"], window_strides=(1, 1), padding="VALID",
        dimension_numbers=("NCHW", "OIHW", "NCHW"))
    dec = dec + params["b_dec"].reshape(1, 192, 1, 1)
    n, _, hf, wf = dec.shape
    rec = (dec.reshape(n, 3, 8, 8, hf, wf)
           .transpose(0, 1, 4, 2, 5, 3)
           .reshape(n, 3, hf * 8, wf * 8))
    return rec


if __name__ == "__main__":
    key = jax.random.PRNGKey(0)
    kx, kp = jax.random.split(key)
    x = jax.random.normal(kx, (2, 3, 16, 16), dtype=jnp.float32)
    params = init_params(kp)

    out = naive_ae_forward(x, params)
    out = jax.block_until_ready(out)

    assert out.shape == (2, 3, 16, 16), out.shape
    assert bool(jnp.all(jnp.isfinite(out)))

    ref = _reference(x, params)
    assert bool(jnp.allclose(out, ref, rtol=1e-2, atol=1e-2)), float(
        jnp.max(jnp.abs(out - ref)))

    print("KERNEL_OK")
</pallas_src>

<mosaic_0001>
module attributes {stable_mosaic.version = 11 : i64} {
  func.func @_enc_dec_kernel(%arg0: i32, %arg1: memref<8x192xf32, #tpu.memory_space<vmem>>, %arg2: memref<192x16xf32, #tpu.memory_space<vmem>>, %arg3: memref<1x16xf32, #tpu.memory_space<vmem>>, %arg4: memref<16x192xf32, #tpu.memory_space<vmem>>, %arg5: memref<1x192xf32, #tpu.memory_space<vmem>>, %arg6: memref<8x192xf32, #tpu.memory_space<vmem>>) attributes {dimension_semantics = [#tpu.dimension_semantics<parallel>], iteration_bounds = array<i64: 1>, scalar_prefetch = 0 : i64, scratch_operands = 0 : i64, tpu.core_type = #tpu.core_type<tc>, window_params = [{transform_indices = @transform_0, window_bounds = array<i64: 8, 192>}, {pipeline_mode = #tpu.pipeline_mode<synchronous>, transform_indices = @transform_1, window_bounds = array<i64: 192, 16>}, {pipeline_mode = #tpu.pipeline_mode<synchronous>, transform_indices = @transform_2, window_bounds = array<i64: 1, 16>}, {pipeline_mode = #tpu.pipeline_mode<synchronous>, transform_indices = @transform_3, window_bounds = array<i64: 16, 192>}, {pipeline_mode = #tpu.pipeline_mode<synchronous>, transform_indices = @transform_4, window_bounds = array<i64: 1, 192>}, {transform_indices = @transform_5, window_bounds = array<i64: 8, 192>}]} {
    %c0 = arith.constant 0 : index
    %c0_0 = arith.constant 0 : index
    %0 = vector.load %arg1[%c0, %c0_0] : memref<8x192xf32, #tpu.memory_space<vmem>>, vector<8x192xf32>
    %c0_1 = arith.constant 0 : index
    %c0_2 = arith.constant 0 : index
    %1 = vector.load %arg2[%c0_1, %c0_2] : memref<192x16xf32, #tpu.memory_space<vmem>>, vector<192x16xf32>
    %cst = arith.constant dense<0.000000e+00> : vector<8x16xf32>
    %2 = tpu.matmul %0, %1, %cst {dimension_numbers = #tpu.dot_dimension_numbers<[1], [0], [0], [1], [0, 0, 1, 1], [], []>} : vector<8x192xf32>, vector<192x16xf32>, vector<8x16xf32> -> vector<8x16xf32>
    %c0_3 = arith.constant 0 : index
    %c0_4 = arith.constant 0 : index
    %3 = vector.load %arg3[%c0_3, %c0_4] : memref<1x16xf32, #tpu.memory_space<vmem>>, vector<1x16xf32>
    %4 = vector.broadcast %3 : vector<1x16xf32> to vector<8x16xf32>
    %5 = arith.addf %2, %4 : vector<8x16xf32>
    %c0_5 = arith.constant 0 : index
    %c0_6 = arith.constant 0 : index
    %6 = vector.load %arg4[%c0_5, %c0_6] : memref<16x192xf32, #tpu.memory_space<vmem>>, vector<16x192xf32>
    %cst_7 = arith.constant dense<0.000000e+00> : vector<8x192xf32>
    %7 = tpu.matmul %5, %6, %cst_7 {dimension_numbers = #tpu.dot_dimension_numbers<[1], [0], [0], [1], [0, 0, 1, 1], [], []>} : vector<8x16xf32>, vector<16x192xf32>, vector<8x192xf32> -> vector<8x192xf32>
    %c0_8 = arith.constant 0 : index
    %c0_9 = arith.constant 0 : index
    %8 = vector.load %arg5[%c0_8, %c0_9] : memref<1x192xf32, #tpu.memory_space<vmem>>, vector<1x192xf32>
    %9 = vector.broadcast %8 : vector<1x192xf32> to vector<8x192xf32>
    %10 = arith.addf %7, %9 : vector<8x192xf32>
    %c0_10 = arith.constant 0 : index
    %c0_11 = arith.constant 0 : index
    %11 = vector.load %arg6[%c0_10, %c0_11] : memref<8x192xf32, #tpu.memory_space<vmem>>, vector<8x192xf32>
    tpu.vector_store %arg6[%c0_10, %c0_11], %10 {strides = array<i32>} : memref<8x192xf32, #tpu.memory_space<vmem>>, vector<8x192xf32>,
    return
  }
  func.func @transform_0(%arg0: i32) -> (i32, i32) {
    %c0_i32 = arith.constant 0 : i32
    %c0_i32_0 = arith.constant 0 : i32
    return %arg0, %c0_i32 : i32, i32
  }
  func.func @transform_1(%arg0: i32) -> (i32, i32) {
    %c0_i32 = arith.constant 0 : i32
    %c0_i32_0 = arith.constant 0 : i32
    %c0_i32_1 = arith.constant 0 : i32
    return %c0_i32, %c0_i32_0 : i32, i32
  }
  func.func @transform_2(%arg0: i32) -> (i32, i32) {
    %c0_i32 = arith.constant 0 : i32
    %c0_i32_0 = arith.constant 0 : i32
    %c0_i32_1 = arith.constant 0 : i32
    return %c0_i32, %c0_i32_0 : i32, i32
  }
  func.func @transform_3(%arg0: i32) -> (i32, i32) {
    %c0_i32 = arith.constant 0 : i32
    %c0_i32_0 = arith.constant 0 : i32
    %c0_i32_1 = arith.constant 0 : i32
    return %c0_i32, %c0_i32_0 : i32, i32
  }
  func.func @transform_4(%arg0: i32) -> (i32, i32) {
    %c0_i32 = arith.constant 0 : i32
    %c0_i32_0 = arith.constant 0 : i32
    %c0_i32_1 = arith.constant 0 : i32
    return %c0_i32, %c0_i32_0 : i32, i32
  }
  func.func @transform_5(%arg0: i32) -> (i32, i32) {
    %c0_i32 = arith.constant 0 : i32
    %c0_i32_0 = arith.constant 0 : i32
    return %arg0, %c0_i32 : i32, i32
  }
}

</mosaic_0001>

<bundles_post_ra>
// kernel: naive_ae_forward.1
= control target key start
LH: loop header
LB: loop body
LE: loop exit
PB: predicated region body
PF: predicated region fallthrough
CT: control target
= control target key end

     0   :  { %v269_v0 = vmov 0.0|0.0   ;;  %vm53_vm0 = vcmask 523264   ;;  %v270_v45 = vmov 0.0   ;;  %vm143_vm1 = vcmask 130048   ;;  %s417_s1 = inlined_call_operand.vmem [shape: f32[192,16], index: 1, kind: input, shape index: {}]   ;;  %s418_s0 = inlined_call_operand.vmem [shape: f32[8,192], index: 0, kind: input, shape index: {}]   ;;  %s419_s3 = inlined_call_operand.vmem [shape: f32[16,192], index: 3, kind: input, shape index: {}]   ;;  %s420_s2 = inlined_call_operand.vmem [shape: f32[1,16], index: 2, kind: input, shape index: {}]   ;;  %s421_s4 = inlined_call_operand.vmem [shape: f32[1,192], index: 4, kind: input, shape index: {}]   ;;  %s422_s5 = inlined_call_operand.vmem [shape: f32[8,192], index: 5, kind: output, shape index: {}]  }
   0x1   :  { %227 = vmatprep.subr.bf16.mxu0 %v269_v0  ;;  %v22_v1 = vld [vmem:[%s417_s1] sm:$0xff]  ;;  %v23_v2 = vld [vmem:[%s417_s1 + $0x8] sm:$0xff]  ;;  %v24_v3 = vld [vmem:[%s417_s1 + $0x10] sm:$0xff]  ;;  %211 = vmatprep.mubr.f32.mxu1 %v270_v45  ;;  %v133_v50 = vlaneseq }
   0x2   :  { %v228_v4 = vpack.c.bf16 %v23_v2, %v22_v1  ;;  %v25_v5 = vld [vmem:[%s417_s1 + $0x18] sm:$0xff]  ;;  %v26_v7 = vld [vmem:[%s417_s1 + $0x20] sm:$0xff]  ;;  %v27_v8 = vld [vmem:[%s417_s1 + $0x28] sm:$0xff] }
   0x3   :  { %v231_v6 = vpack.c.bf16 %v25_v5, %v24_v3  ;;  %v234_v9 = vpack.c.bf16 %v27_v8, %v26_v7  ;;  %v28_v10 = vld [vmem:[%s417_s1 + $0x30] sm:$0xff]  ;;  %v29_v11 = vld [vmem:[%s417_s1 + $0x38] sm:$0xff]  ;;  %v21_v12 = vld [vmem:[%s418_s0 + $0x8] sm:$0xff]  ;;  %v134_v51 = vshrl.u32 %v133_v50, 7 }
   0x4   :  { %229 = vmatpush1.bf16.msra.mxu0 %v228_v4  ;;  %v128_v13 = vld [vmem:[%s419_s3 + $0x8] sm:$0xff]  ;;  %225 = vmatprep.mubr.msk.f32.mxu0 %vm53_vm0, %v21_v12  ;;  %v130_v14 = vld [vmem:[%s419_s3 + $0x18] sm:$0xff]  ;;  %v237_v16 = vpack.c.bf16 %v29_v11, %v28_v10  ;;  %v30_v17 = vld [vmem:[%s417_s1 + $0x40] sm:$0xff] }
   0x5   :  { %230 = vmatprep.subr.bf16.mxu0 %v269_v0  ;;  %v263_v15 = vpack.c.bf16 %v130_v14, %v128_v13  ;;  %v31_v18 = vld [vmem:[%s417_s1 + $0x48] sm:$0xff]  ;;  %v32_v20 = vld [vmem:[%s417_s1 + $0x50] sm:$0xff]  ;;  %v33_v21 = vld [vmem:[%s417_s1 + $0x58] sm:$0xff]  ;;  %v135_v52 = vsub.s32 0, %v134_v51  ;;  %v139_v54 = vsub.s32 1, %v134_v51 }
   0x6   :  { %v240_v19 = vpack.c.bf16 %v31_v18, %v30_v17  ;;  %v243_v22 = vpack.c.bf16 %v33_v21, %v32_v20  ;;  %v34_v23 = vld [vmem:[%s417_s1 + $0x60] sm:$0xff]  ;;  %v35_v24 = vld [vmem:[%s417_s1 + $0x68] sm:$0xff]  ;;  %v36_v26 = vld [vmem:[%s417_s1 + $0x70] sm:$0xff] }
   0x7   :  { %264 = vmatprep.subr.bf16.mxu1 %v263_v15  ;;  %v246_v25 = vpack.c.bf16 %v35_v24, %v34_v23  ;;  %v37_v27 = vld [vmem:[%s417_s1 + $0x78] sm:$0xff]  ;;  %v38_v29 = vld [vmem:[%s417_s1 + $0x80] sm:$0xff]  ;;  %v39_v30 = vld [vmem:[%s417_s1 + $0x88] sm:$0xff] }
   0x8   :  { %232 = vmatpush1.bf16.msra.mxu0 %v231_v6  ;;  %v249_v28 = vpack.c.bf16 %v37_v27, %v36_v26  ;;  %v252_v31 = vpack.c.bf16 %v39_v30, %v38_v29  ;;  %v40_v32 = vld [vmem:[%s417_s1 + $0x90] sm:$0xff]  ;;  %v41_v33 = vld [vmem:[%s417_s1 + $0x98] sm:$0xff]  ;;  %v42_v35 = vld [vmem:[%s417_s1 + $0xa0] sm:$0xff] }
   0x9   :  { %233 = vmatprep.subr.bf16.mxu0 %v269_v0  ;;  %v255_v34 = vpack.c.bf16 %v41_v33, %v40_v32  ;;  %v43_v36 = vld [vmem:[%s417_s1 + $0xa8] sm:$0xff]  ;;  %v44_v38 = vld [vmem:[%s417_s1 + $0xb0] sm:$0xff]  ;;  %v45_v39 = vld [vmem:[%s417_s1 + $0xb8] sm:$0xff] }
   0xa   :  { %v258_v37 = vpack.c.bf16 %v43_v36, %v42_v35  ;;  %v261_v40 = vpack.c.bf16 %v45_v39, %v44_v38  ;;  %v20_v41 = vld [vmem:[%s418_s0] sm:$0xff]  ;;  %v129_v43 = vld [vmem:[%s419_s3 + $0x10] sm:$0xff] }
   0xb   :  { %v127_v42 = vld [vmem:[%s419_s3] sm:$0xff] }
   0xc   :  { %235 = vmatpush1.bf16.msra.mxu0 %v234_v9  ;;  %v265_v44 = vpack.c.bf16 %v129_v43, %v127_v42  ;;  %v224_v46 = vld [vmem:[%s420_s2] ss:$0 sm:$0xff] }
   0xd   :  { %236 = vmatprep.subr.bf16.mxu0 %v269_v0  ;;  %v131_v53 = vld [vmem:[%s421_s4] sm:$0x3] }
   0xe   :  { %266 = vmatpush1.bf16.msra.mxu1 %v265_v44  ;;  %v136_v55 = vrot.slane %v131_v53, %v135_v52  ;;  %v140_v56 = vrot.slane %v131_v53, %v139_v54 }
  0x10   :  { %238 = vmatpush1.bf16.msra.mxu0 %v237_v16 }
  0x11   :  { %239 = vmatprep.subr.bf16.mxu0 %v269_v0 }
  0x14   :  { %241 = vmatpush1.bf16.msra.mxu0 %v240_v19 }
  0x15   :  { %242 = vmatprep.subr.bf16.mxu0 %v269_v0 }
  0x18   :  { %244 = vmatpush1.bf16.msra.mxu0 %v243_v22 }
  0x19   :  { %245 = vmatprep.subr.bf16.mxu0 %v269_v0 }
  0x1c   :  { %247 = vmatpush1.bf16.msra.mxu0 %v246_v25 }
  0x1d   :  { %248 = vmatprep.subr.bf16.mxu0 %v269_v0 }
  0x20   :  { %250 = vmatpush1.bf16.msra.mxu0 %v249_v28 }
  0x21   :  { %251 = vmatprep.subr.bf16.mxu0 %v269_v0 }
  0x24   :  { %253 = vmatpush1.bf16.msra.mxu0 %v252_v31 }
  0x25   :  { %254 = vmatprep.subr.bf16.mxu0 %v269_v0 }
  0x28   :  { %256 = vmatpush1.bf16.msra.mxu0 %v255_v34 }
  0x29   :  { %257 = vmatprep.subr.bf16.mxu0 %v269_v0 }
  0x2c   :  { %259 = vmatpush1.bf16.msra.mxu0 %v258_v37 }
  0x2d   :  { %260 = vmatprep.subr.bf16.mxu0 %v269_v0 }
  0x30   :  { %262 = vmatpush1.bf16.msra.mxu0 %v261_v40 }
  0x33   :  { %122 = vmatmul.mubr.f32.vlgmr.msra.gmra.mrb[0].mxu0 %v20_v41 }
 0x106   :  { %v123_v47 = vpop.f32.mrb[0].mxu0 }
 0x107   :  { %v124_v48 = vadd.f32 %v224_v46, %v123_v47  ;;  %v125_v49 = vpop.f32.mrb[1].mxu0 }
 0x109   :  { %226 = vmatmul.mubr.msk.f32.vlgmr.msra.gmra.mrb[0].mxu1 %vm143_vm1, %v124_v48 }
 0x1dc   :  { %v213_v57 = vpop.f32.mrb[0].mxu1 }
 0x1dd   :  { %v214_v58 = vadd.f32 %v213_v57, %v136_v55  ;;  %v215_v59 = vpop.f32.mrb[1].mxu1 }
 0x1de   :  { %v216_v60 = vadd.f32 %v215_v59, %v140_v56 }
 0x1df   :  { %218 = vst [vmem:[%s422_s5] sm:$0xff] %v214_v58 }
 0x1e0   :  { %219 = vst.msk [vmem:[%s422_s5 + $0x8] sm:$0xff] %vm53_vm0, %v216_v60 }

</bundles_post_ra>
